<compile_context>
chip_gen: v7x
topology: tpu7x:2x2x1
jax: 0.10.0
libtpu: 0.0.40
codegen_flags: <defaults>
</compile_context>

<pallas_src>
import jax
import jax.numpy as jnp
from jax import lax
from jax.experimental import pallas as pl
from jax.experimental.pallas import tpu as pltpu


def _model2_kernel(len_ref,                       # scalar prefetch: [B] int32 (SMEM)
                   src_ref, tgt_ref,              # [1,S,E] bf16, [1,T,E] bf16
                   wenc_ref, benc_ref,            # [E,H] bf16,   [1,H] f32
                   wdec_ref, bdec_ref,            # [E,H] bf16,   [1,H] f32
                   wc_ref, wh_ref, bout_ref,      # [H,H] bf16 x2,[1,H] f32
                   dec_out_ref, attn_ref, mem_ref, enc_ref):
    b = pl.program_id(0)
    S = src_ref.shape[1]
    L = len_ref[b]                                 # valid source length for this batch

    # ---- encoder / decoder input projections (bf16 MXU, f32 accumulation) ----
    mem = jnp.tanh(
        jnp.dot(src_ref[0], wenc_ref[...], preferred_element_type=jnp.float32)
        + benc_ref[...])                           # [S, H] f32
    dec_h = jnp.tanh(
        jnp.dot(tgt_ref[0], wdec_ref[...], preferred_element_type=jnp.float32)
        + bdec_ref[...])                           # [T, H] f32

    mem_bf = mem.astype(jnp.bfloat16)
    dec_bf = dec_h.astype(jnp.bfloat16)

    # ---- attention scores: contract last dims of both operands (no transpose) ----
    scores = lax.dot_general(dec_bf, mem_bf, (((1,), (1,)), ((), ())),
                             preferred_element_type=jnp.float32)   # [T, S] f32

    # source-length mask built in-kernel from the prefetched length (f32 path)
    valid = (lax.broadcasted_iota(jnp.int32, (1, S), 1) < L).astype(jnp.float32)
    scores = jnp.where(valid > 0.0, scores, jnp.float32(-1e30))

    # ---- softmax in f32; denominator reciprocal on the EUP ----
    m = jnp.max(scores, axis=-1, keepdims=True)
    e = jnp.exp(scores - m)
    denom = jnp.sum(e, axis=-1, keepdims=True)
    attn = e * pl.reciprocal(denom, approx=True)   # [T, S] f32

    # ---- context + output projection (two accumulating dots, no lane concat) ----
    ctx = jnp.dot(attn.astype(jnp.bfloat16), mem_bf,
                  preferred_element_type=jnp.float32)              # [T, H] f32
    out = jnp.tanh(
        jnp.dot(ctx.astype(jnp.bfloat16), wc_ref[...],
                preferred_element_type=jnp.float32)
        + jnp.dot(dec_bf, wh_ref[...], preferred_element_type=jnp.float32)
        + bout_ref[...])                                            # [T, H] f32

    # ---- enc_state2: masked mean over valid source positions (f32) ----
    msum = jnp.dot(valid, mem, preferred_element_type=jnp.float32)  # [1, H]
    count = jnp.maximum(jnp.sum(valid), 1.0)
    enc = msum / count

    # lane-dense (H / S multiples of 128), unmasked stores
    dec_out_ref[0] = out
    attn_ref[0] = attn
    mem_ref[0] = mem
    enc_ref[0] = enc


def model2_forward(src2, tgt, lengths2, params,
                   src1=None, memory_bank1=None, lengths1=None, bptt=False):
    """src2: [S, B, E], tgt: [T_full, B, E] (seq-major, OpenNMT convention)."""
    del src1, memory_bank1, lengths1, bptt   # no learned effect in this synthetic model
    tgt = tgt[:-1]                            # exactly as in Model2.forward

    S, B, E = src2.shape
    T = tgt.shape[0]
    H = params["W_enc"].shape[1]

    # batch-major blocks for the per-batch grid; cast MXU operands to bf16
    src_b = jnp.transpose(src2, (1, 0, 2)).astype(jnp.bfloat16)   # [B, S, E]
    tgt_b = jnp.transpose(tgt, (1, 0, 2)).astype(jnp.bfloat16)    # [B, T, E]
    wenc = params["W_enc"].astype(jnp.bfloat16)
    wdec = params["W_dec"].astype(jnp.bfloat16)
    wc = params["W_c"].astype(jnp.bfloat16)
    wh = params["W_h"].astype(jnp.bfloat16)
    lengths_i32 = lengths2.astype(jnp.int32)

    def batch_spec(d1, d2):      # per-batch block, walks the leading (batch) axis
        return pl.BlockSpec((1, d1, d2), lambda b, lens: (b, 0, 0))

    def resident_spec(d1, d2):   # constant block index -> stays resident in VMEM
        return pl.BlockSpec((d1, d2), lambda b, lens: (0, 0))

    dec_b, attn_b, mem_b, enc_b = pl.pallas_call(
        _model2_kernel,
        out_shape=(
            jax.ShapeDtypeStruct((B, T, H), jnp.float32),   # dec_out (batch-major)
            jax.ShapeDtypeStruct((B, T, S), jnp.float32),   # attn "std"
            jax.ShapeDtypeStruct((B, S, H), jnp.float32),   # memory_bank2
            jax.ShapeDtypeStruct((B, 1, H), jnp.float32),   # enc_state2
        ),
        grid_spec=pltpu.PrefetchScalarGridSpec(
            num_scalar_prefetch=1,                          # lengths2 -> SMEM
            grid=(B,),
            in_specs=[
                batch_spec(S, E),          # src  (bf16)
                batch_spec(T, E),          # tgt  (bf16)
                resident_spec(E, H),       # W_enc (bf16)
                resident_spec(1, H),       # b_enc (f32)
                resident_spec(E, H),       # W_dec (bf16)
                resident_spec(1, H),       # b_dec (f32)
                resident_spec(H, H),       # W_c   (bf16)
                resident_spec(H, H),       # W_h   (bf16)
                resident_spec(1, H),       # b_out (f32)
            ],
            out_specs=[
                batch_spec(T, H),
                batch_spec(T, S),
                batch_spec(S, H),
                batch_spec(1, H),
            ],
        ),
        compiler_params=pltpu.CompilerParams(
            dimension_semantics=("parallel",),              # v7x: 2nd TC takes half the batches
            vmem_limit_bytes=32 * 1024 * 1024),
    )(lengths_i32, src_b, tgt_b,
      wenc, params["b_enc"], wdec, params["b_dec"], wc, wh, params["b_out"])

    # back to OpenNMT seq-major layouts
    dec_out = jnp.transpose(dec_b, (1, 0, 2))        # [T, B, H]
    attn_std = jnp.transpose(attn_b, (1, 0, 2))      # [T, B, S]
    memory_bank2 = jnp.transpose(mem_b, (1, 0, 2))   # [S, B, H]
    enc_state2 = enc_b[:, 0, :]                      # [B, H]

    attns = {"std": attn_std,
             "memory_bank2": memory_bank2,
             "enc_state2": enc_state2,
             "lengths2": lengths2}
    return dec_out, attns


def init_params(key, emb_dim, hidden):
    ks = jax.random.split(key, 5)
    scale = 0.1
    return {
        "W_enc": scale * jax.random.normal(ks[0], (emb_dim, hidden), jnp.float32),
        "b_enc": jnp.zeros((1, hidden), jnp.float32),
        "W_dec": scale * jax.random.normal(ks[1], (emb_dim, hidden), jnp.float32),
        "b_dec": jnp.zeros((1, hidden), jnp.float32),
        "W_c":   scale * jax.random.normal(ks[2], (hidden, hidden), jnp.float32),
        "W_h":   scale * jax.random.normal(ks[3], (hidden, hidden), jnp.float32),
        "b_out": scale * jax.random.normal(ks[4], (1, hidden), jnp.float32),
    }


def _reference_forward(src2, tgt_full, lengths2, params):
    """Pure-JAX f32 reference of the same synthetic encoder/decoder."""
    hi = jax.lax.Precision.HIGHEST
    tgt = tgt_full[:-1]
    S, B, E = src2.shape
    mem = jnp.tanh(jnp.einsum('sbe,eh->sbh', src2, params["W_enc"], precision=hi)
                   + params["b_enc"][0])
    dec_h = jnp.tanh(jnp.einsum('tbe,eh->tbh', tgt, params["W_dec"], precision=hi)
                     + params["b_dec"][0])
    scores = jnp.einsum('tbh,sbh->tbs', dec_h, mem, precision=hi)
    valid = (jnp.arange(S)[None, :] < lengths2[:, None]).astype(jnp.float32)   # [B, S]
    scores = jnp.where(valid[None, :, :] > 0, scores, jnp.float32(-1e30))
    attn = jax.nn.softmax(scores, axis=-1)
    ctx = jnp.einsum('tbs,sbh->tbh', attn, mem, precision=hi)
    out = jnp.tanh(jnp.einsum('tbh,hk->tbk', ctx, params["W_c"], precision=hi)
                   + jnp.einsum('tbh,hk->tbk', dec_h, params["W_h"], precision=hi)
                   + params["b_out"][0])
    enc_state = (jnp.einsum('sbh,bs->bh', mem, valid, precision=hi)
                 / jnp.maximum(lengths2.astype(jnp.float32), 1.0)[:, None])
    return out, attn, mem, enc_state


if __name__ == "__main__":
    # Small shapes consistent with the forward; H and S chosen as multiples of
    # 128 so every output store is 128-lane dense (unmasked vst).
    S, T_FULL, B, E, H = 128, 9, 2, 32, 128

    key = jax.random.PRNGKey(0)
    k_src, k_tgt, k_par = jax.random.split(key, 3)

    src2 = jax.random.normal(k_src, (S, B, E), jnp.float32)
    tgt = jax.random.normal(k_tgt, (T_FULL, B, E), jnp.float32)
    lengths2 = jnp.array([S, S - 32], dtype=jnp.int32)   # exercise the source-length mask

    params = init_params(k_par, E, H)

    dec_out, attns = model2_forward(src2, tgt, lengths2, params)
    jax.block_until_ready(dec_out)
    jax.block_until_ready(attns["std"])

    # shape checks
    assert dec_out.shape == (T_FULL - 1, B, H)
    assert attns["std"].shape == (T_FULL - 1, B, S)
    assert attns["memory_bank2"].shape == (S, B, H)
    assert attns["enc_state2"].shape == (B, H)

    # attention rows sum to 1 (approx reciprocal -> loose tolerance)
    assert jnp.allclose(jnp.sum(attns["std"], axis=-1), 1.0, atol=5e-3)

    # numerical check against the f32 reference (kernel matmuls are bf16/f32-acc)
    ref_dec, ref_attn, ref_mem, ref_enc = _reference_forward(src2, tgt, lengths2, params)
    assert jnp.allclose(dec_out, ref_dec, atol=2e-2, rtol=2e-2)
    assert jnp.allclose(attns["std"], ref_attn, atol=2e-2, rtol=2e-2)
    assert jnp.allclose(attns["memory_bank2"], ref_mem, atol=1e-2, rtol=1e-2)
    assert jnp.allclose(attns["enc_state2"], ref_enc, atol=1e-2, rtol=1e-2)

    print("KERNEL_OK")
</pallas_src>

<mosaic_0001>
module attributes {stable_mosaic.version = 11 : i64} {
  func.func @_model2_kernel(%arg0: i32, %arg1: memref<2xi32, #tpu.memory_space<smem>>, %arg2: memref<1x128x32xbf16, #tpu.memory_space<vmem>>, %arg3: memref<1x8x32xbf16, #tpu.memory_space<vmem>>, %arg4: memref<32x128xbf16, #tpu.memory_space<vmem>>, %arg5: memref<1x128xf32, #tpu.memory_space<vmem>>, %arg6: memref<32x128xbf16, #tpu.memory_space<vmem>>, %arg7: memref<1x128xf32, #tpu.memory_space<vmem>>, %arg8: memref<128x128xbf16, #tpu.memory_space<vmem>>, %arg9: memref<128x128xbf16, #tpu.memory_space<vmem>>, %arg10: memref<1x128xf32, #tpu.memory_space<vmem>>, %arg11: memref<1x8x128xf32, #tpu.memory_space<vmem>>, %arg12: memref<1x8x128xf32, #tpu.memory_space<vmem>>, %arg13: memref<1x128x128xf32, #tpu.memory_space<vmem>>, %arg14: memref<1x1x128xf32, #tpu.memory_space<vmem>>) attributes {dimension_semantics = [#tpu.dimension_semantics<parallel>], iteration_bounds = array<i64: 2>, scalar_prefetch = 1 : i64, scratch_operands = 0 : i64, tpu.core_type = #tpu.core_type<tc>, window_params = [{transform_indices = @transform_0, window_bounds = array<i64: 1, 128, 32>}, {transform_indices = @transform_1, window_bounds = array<i64: 1, 8, 32>}, {pipeline_mode = #tpu.pipeline_mode<synchronous>, transform_indices = @transform_2, window_bounds = array<i64: 32, 128>}, {pipeline_mode = #tpu.pipeline_mode<synchronous>, transform_indices = @transform_3, window_bounds = array<i64: 1, 128>}, {pipeline_mode = #tpu.pipeline_mode<synchronous>, transform_indices = @transform_4, window_bounds = array<i64: 32, 128>}, {pipeline_mode = #tpu.pipeline_mode<synchronous>, transform_indices = @transform_5, window_bounds = array<i64: 1, 128>}, {pipeline_mode = #tpu.pipeline_mode<synchronous>, transform_indices = @transform_6, window_bounds = array<i64: 128, 128>}, {pipeline_mode = #tpu.pipeline_mode<synchronous>, transform_indices = @transform_7, window_bounds = array<i64: 128, 128>}, {pipeline_mode = #tpu.pipeline_mode<synchronous>, transform_indices = @transform_8, window_bounds = array<i64: 1, 128>}, {transform_indices = @transform_9, window_bounds = array<i64: 1, 8, 128>}, {transform_indices = @transform_10, window_bounds = array<i64: 1, 8, 128>}, {transform_indices = @transform_11, window_bounds = array<i64: 1, 128, 128>}, {transform_indices = @transform_12, window_bounds = array<i64: 1, 1, 128>}]} {
    %0 = arith.index_cast %arg0 : i32 to index
    %1 = memref.load %arg1[%0] : memref<2xi32, #tpu.memory_space<smem>>
    %c0 = arith.constant 0 : index
    %c0_0 = arith.constant 0 : index
    %c0_1 = arith.constant 0 : index
    %2 = vector.load %arg2[%c0, %c0_0, %c0_1] : memref<1x128x32xbf16, #tpu.memory_space<vmem>>, vector<1x128x32xbf16>
    %3 = vector.shape_cast %2 : vector<1x128x32xbf16> to vector<128x32xbf16>
    %c0_2 = arith.constant 0 : index
    %c0_3 = arith.constant 0 : index
    %4 = vector.load %arg4[%c0_2, %c0_3] : memref<32x128xbf16, #tpu.memory_space<vmem>>, vector<32x128xbf16>
    %cst = arith.constant dense<0.000000e+00> : vector<128x128xf32>
    %5 = tpu.matmul %3, %4, %cst {dimension_numbers = #tpu.dot_dimension_numbers<[1], [0], [0], [1], [0, 0, 1, 1], [], []>} : vector<128x32xbf16>, vector<32x128xbf16>, vector<128x128xf32> -> vector<128x128xf32>
    %c0_4 = arith.constant 0 : index
    %c0_5 = arith.constant 0 : index
    %6 = vector.load %arg5[%c0_4, %c0_5] : memref<1x128xf32, #tpu.memory_space<vmem>>, vector<1x128xf32>
    %7 = vector.broadcast %6 : vector<1x128xf32> to vector<128x128xf32>
    %8 = arith.addf %5, %7 : vector<128x128xf32>
    %9 = math.tanh %8 : vector<128x128xf32>
    %c0_6 = arith.constant 0 : index
    %c0_7 = arith.constant 0 : index
    %c0_8 = arith.constant 0 : index
    %10 = vector.load %arg3[%c0_6, %c0_7, %c0_8] : memref<1x8x32xbf16, #tpu.memory_space<vmem>>, vector<1x8x32xbf16>
    %11 = vector.shape_cast %10 : vector<1x8x32xbf16> to vector<8x32xbf16>
    %c0_9 = arith.constant 0 : index
    %c0_10 = arith.constant 0 : index
    %12 = vector.load %arg6[%c0_9, %c0_10] : memref<32x128xbf16, #tpu.memory_space<vmem>>, vector<32x128xbf16>
    %cst_11 = arith.constant dense<0.000000e+00> : vector<8x128xf32>
    %13 = tpu.matmul %11, %12, %cst_11 {dimension_numbers = #tpu.dot_dimension_numbers<[1], [0], [0], [1], [0, 0, 1, 1], [], []>} : vector<8x32xbf16>, vector<32x128xbf16>, vector<8x128xf32> -> vector<8x128xf32>
    %c0_12 = arith.constant 0 : index
    %c0_13 = arith.constant 0 : index
    %14 = vector.load %arg7[%c0_12, %c0_13] : memref<1x128xf32, #tpu.memory_space<vmem>>, vector<1x128xf32>
    %15 = vector.broadcast %14 : vector<1x128xf32> to vector<8x128xf32>
    %16 = arith.addf %13, %15 : vector<8x128xf32>
    %17 = math.tanh %16 : vector<8x128xf32>
    %18 = arith.truncf %9 : vector<128x128xf32> to vector<128x128xbf16>
    %19 = arith.truncf %17 : vector<8x128xf32> to vector<8x128xbf16>
    %cst_14 = arith.constant dense<0.000000e+00> : vector<8x128xf32>
    %20 = tpu.matmul %19, %18, %cst_14 {dimension_numbers = #tpu.dot_dimension_numbers<[1], [1], [0], [0], [0, 0, 1, 0], [], []>} : vector<8x128xbf16>, vector<128x128xbf16>, vector<8x128xf32> -> vector<8x128xf32>
    %21 = tpu.iota {dimensions = array<i32: 1>} : vector<1x128xi32>
    %22 = vector.broadcast %1 : i32 to vector<1x128xi32>
    %23 = arith.cmpi slt, %21, %22 : vector<1x128xi32>
    %24 = arith.extui %23 : vector<1x128xi1> to vector<1x128xi32>
    %25 = arith.sitofp %24 : vector<1x128xi32> to vector<1x128xf32>
    %cst_15 = arith.constant 0.000000e+00 : f32
    %26 = vector.broadcast %cst_15 : f32 to vector<1x128xf32>
    %27 = arith.cmpf ogt, %25, %26 : vector<1x128xf32>
    %cst_16 = arith.constant -1.000000e+30 : f32
    %28 = vector.shape_cast %27 : vector<1x128xi1> to vector<1x128xi1>
    %29 = vector.broadcast %28 : vector<1x128xi1> to vector<8x128xi1>
    %30 = vector.broadcast %cst_16 : f32 to vector<8x128xf32>
    %31 = arith.select %29, %20, %30 : vector<8x128xi1>, vector<8x128xf32>
    %cst_17 = arith.constant dense<0xFF800000> : vector<8xf32>
    %32 = vector.multi_reduction <maximumf>, %31, %cst_17 [1] : vector<8x128xf32> to vector<8xf32>
    %33 = vector.shape_cast %32 : vector<8xf32> to vector<8x1xf32>
    %34 = vector.broadcast %33 : vector<8x1xf32> to vector<8x128xf32>
    %35 = arith.subf %31, %34 : vector<8x128xf32>
    %36 = math.exp %35 : vector<8x128xf32>
    %cst_18 = arith.constant dense<0.000000e+00> : vector<8xf32>
    %37 = vector.multi_reduction <add>, %36, %cst_18 [1] : vector<8x128xf32> to vector<8xf32>
    %38 = vector.shape_cast %37 : vector<8xf32> to vector<8x1xf32>
    %39 = tpu.reciprocal %38 {approx = true} : vector<8x1xf32> -> vector<8x1xf32>
    %40 = vector.broadcast %39 : vector<8x1xf32> to vector<8x128xf32>
    %41 = arith.mulf %36, %40 : vector<8x128xf32>
    %42 = arith.truncf %41 : vector<8x128xf32> to vector<8x128xbf16>
    %cst_19 = arith.constant dense<0.000000e+00> : vector<8x128xf32>
    %43 = tpu.matmul %42, %18, %cst_19 {dimension_numbers = #tpu.dot_dimension_numbers<[1], [0], [0], [1], [0, 0, 1, 1], [], []>} : vector<8x128xbf16>, vector<128x128xbf16>, vector<8x128xf32> -> vector<8x128xf32>
    %44 = arith.truncf %43 : vector<8x128xf32> to vector<8x128xbf16>
    %c0_20 = arith.constant 0 : index
    %c0_21 = arith.constant 0 : index
    %45 = vector.load %arg8[%c0_20, %c0_21] : memref<128x128xbf16, #tpu.memory_space<vmem>>, vector<128x128xbf16>
    %cst_22 = arith.constant dense<0.000000e+00> : vector<8x128xf32>
    %46 = tpu.matmul %44, %45, %cst_22 {dimension_numbers = #tpu.dot_dimension_numbers<[1], [0], [0], [1], [0, 0, 1, 1], [], []>} : vector<8x128xbf16>, vector<128x128xbf16>, vector<8x128xf32> -> vector<8x128xf32>
    %c0_23 = arith.constant 0 : index
    %c0_24 = arith.constant 0 : index
    %47 = vector.load %arg9[%c0_23, %c0_24] : memref<128x128xbf16, #tpu.memory_space<vmem>>, vector<128x128xbf16>
    %cst_25 = arith.constant dense<0.000000e+00> : vector<8x128xf32>
    %48 = tpu.matmul %19, %47, %cst_25 {dimension_numbers = #tpu.dot_dimension_numbers<[1], [0], [0], [1], [0, 0, 1, 1], [], []>} : vector<8x128xbf16>, vector<128x128xbf16>, vector<8x128xf32> -> vector<8x128xf32>
    %49 = arith.addf %46, %48 : vector<8x128xf32>
    %c0_26 = arith.constant 0 : index
    %c0_27 = arith.constant 0 : index
    %50 = vector.load %arg10[%c0_26, %c0_27] : memref<1x128xf32, #tpu.memory_space<vmem>>, vector<1x128xf32>
    %51 = vector.broadcast %50 : vector<1x128xf32> to vector<8x128xf32>
    %52 = arith.addf %49, %51 : vector<8x128xf32>
    %53 = math.tanh %52 : vector<8x128xf32>
    %cst_28 = arith.constant dense<0.000000e+00> : vector<1x128xf32>
    %54 = tpu.matmul %25, %9, %cst_28 {dimension_numbers = #tpu.dot_dimension_numbers<[1], [0], [0], [1], [0, 0, 1, 1], [], []>} : vector<1x128xf32>, vector<128x128xf32>, vector<1x128xf32> -> vector<1x128xf32>
    %55 = vector.shape_cast %25 : vector<1x128xf32> to vector<1x1x128xf32>
    %cst_29 = arith.constant dense<0.000000e+00> : vector<1xf32>
    %56 = vector.multi_reduction <add>, %55, %cst_29 [1, 2] : vector<1x1x128xf32> to vector<1xf32>
    %57 = vector.shape_cast %56 : vector<1xf32> to vector<1x1x1xf32>
    %58 = vector.extract %57[0, 0, 0] : f32 from vector<1x1x1xf32>
    %cst_30 = arith.constant 1.000000e+00 : f32
    %59 = arith.maximumf %58, %cst_30 : f32
    %60 = vector.broadcast %59 : f32 to vector<1x128xf32>
    %61 = arith.divf %54, %60 : vector<1x128xf32>
    %c0_31 = arith.constant 0 : index
    %c0_32 = arith.constant 0 : index
    %c0_33 = arith.constant 0 : index
    %62 = vector.load %arg11[%c0_31, %c0_32, %c0_33] : memref<1x8x128xf32, #tpu.memory_space<vmem>>, vector<1x8x128xf32>
    %63 = vector.shape_cast %62 : vector<1x8x128xf32> to vector<8x128xf32>
    %64 = vector.shape_cast %53 : vector<8x128xf32> to vector<1x8x128xf32>
    tpu.vector_store %arg11[%c0_31, %c0_32, %c0_33], %64 {strides = array<i32>} : memref<1x8x128xf32, #tpu.memory_space<vmem>>, vector<1x8x128xf32>,
    %c0_34 = arith.constant 0 : index
    %c0_35 = arith.constant 0 : index
    %c0_36 = arith.constant 0 : index
    %65 = vector.load %arg12[%c0_34, %c0_35, %c0_36] : memref<1x8x128xf32, #tpu.memory_space<vmem>>, vector<1x8x128xf32>
    %66 = vector.shape_cast %65 : vector<1x8x128xf32> to vector<8x128xf32>
    %67 = vector.shape_cast %41 : vector<8x128xf32> to vector<1x8x128xf32>
    tpu.vector_store %arg12[%c0_34, %c0_35, %c0_36], %67 {strides = array<i32>} : memref<1x8x128xf32, #tpu.memory_space<vmem>>, vector<1x8x128xf32>,
    %c0_37 = arith.constant 0 : index
    %c0_38 = arith.constant 0 : index
    %c0_39 = arith.constant 0 : index
    %68 = vector.load %arg13[%c0_37, %c0_38, %c0_39] : memref<1x128x128xf32, #tpu.memory_space<vmem>>, vector<1x128x128xf32>
    %69 = vector.shape_cast %68 : vector<1x128x128xf32> to vector<128x128xf32>
    %70 = vector.shape_cast %9 : vector<128x128xf32> to vector<1x128x128xf32>
    tpu.vector_store %arg13[%c0_37, %c0_38, %c0_39], %70 {strides = array<i32>} : memref<1x128x128xf32, #tpu.memory_space<vmem>>, vector<1x128x128xf32>,
    %c0_40 = arith.constant 0 : index
    %c0_41 = arith.constant 0 : index
    %c0_42 = arith.constant 0 : index
    %71 = vector.load %arg14[%c0_40, %c0_41, %c0_42] : memref<1x1x128xf32, #tpu.memory_space<vmem>>, vector<1x1x128xf32>
    %72 = vector.shape_cast %71 : vector<1x1x128xf32> to vector<1x128xf32>
    %73 = vector.shape_cast %61 : vector<1x128xf32> to vector<1x1x128xf32>
    tpu.vector_store %arg14[%c0_40, %c0_41, %c0_42], %73 {strides = array<i32>} : memref<1x1x128xf32, #tpu.memory_space<vmem>>, vector<1x1x128xf32>,
    return
  }
  func.func @transform_0(%arg0: i32, %arg1: memref<2xi32, #tpu.memory_space<smem>>) -> (i32, i32, i32) {
    %c0_i32 = arith.constant 0 : i32
    %c0_i32_0 = arith.constant 0 : i32
    %c0_i32_1 = arith.constant 0 : i32
    return %arg0, %c0_i32, %c0_i32_0 : i32, i32, i32
  }
  func.func @transform_1(%arg0: i32, %arg1: memref<2xi32, #tpu.memory_space<smem>>) -> (i32, i32, i32) {
    %c0_i32 = arith.constant 0 : i32
    %c0_i32_0 = arith.constant 0 : i32
    %c0_i32_1 = arith.constant 0 : i32
    return %arg0, %c0_i32, %c0_i32_0 : i32, i32, i32
  }
  func.func @transform_2(%arg0: i32, %arg1: memref<2xi32, #tpu.memory_space<smem>>) -> (i32, i32) {
    %c0_i32 = arith.constant 0 : i32
    %c0_i32_0 = arith.constant 0 : i32
    %c0_i32_1 = arith.constant 0 : i32
    return %c0_i32, %c0_i32_0 : i32, i32
  }
  func.func @transform_3(%arg0: i32, %arg1: memref<2xi32, #tpu.memory_space<smem>>) -> (i32, i32) {
    %c0_i32 = arith.constant 0 : i32
    %c0_i32_0 = arith.constant 0 : i32
    %c0_i32_1 = arith.constant 0 : i32
    return %c0_i32, %c0_i32_0 : i32, i32
  }
  func.func @transform_4(%arg0: i32, %arg1: memref<2xi32, #tpu.memory_space<smem>>) -> (i32, i32) {
    %c0_i32 = arith.constant 0 : i32
    %c0_i32_0 = arith.constant 0 : i32
    %c0_i32_1 = arith.constant 0 : i32
    return %c0_i32, %c0_i32_0 : i32, i32
  }
  func.func @transform_5(%arg0: i32, %arg1: memref<2xi32, #tpu.memory_space<smem>>) -> (i32, i32) {
    %c0_i32 = arith.constant 0 : i32
    %c0_i32_0 = arith.constant 0 : i32
    %c0_i32_1 = arith.constant 0 : i32
    return %c0_i32, %c0_i32_0 : i32, i32
  }
  func.func @transform_6(%arg0: i32, %arg1: memref<2xi32, #tpu.memory_space<smem>>) -> (i32, i32) {
    %c0_i32 = arith.constant 0 : i32
    %c0_i32_0 = arith.constant 0 : i32
    %c0_i32_1 = arith.constant 0 : i32
    return %c0_i32, %c0_i32_0 : i32, i32
  }
  func.func @transform_7(%arg0: i32, %arg1: memref<2xi32, #tpu.memory_space<smem>>) -> (i32, i32) {
    %c0_i32 = arith.constant 0 : i32
    %c0_i32_0 = arith.constant 0 : i32
    %c0_i32_1 = arith.constant 0 : i32
    return %c0_i32, %c0_i32_0 : i32, i32
  }
  func.func @transform_8(%arg0: i32, %arg1: memref<2xi32, #tpu.memory_space<smem>>) -> (i32, i32) {
    %c0_i32 = arith.constant 0 : i32
    %c0_i32_0 = arith.constant 0 : i32
    %c0_i32_1 = arith.constant 0 : i32
    return %c0_i32, %c0_i32_0 : i32, i32
  }
  func.func @transform_9(%arg0: i32, %arg1: memref<2xi32, #tpu.memory_space<smem>>) -> (i32, i32, i32) {
    %c0_i32 = arith.constant 0 : i32
    %c0_i32_0 = arith.constant 0 : i32
    %c0_i32_1 = arith.constant 0 : i32
    return %arg0, %c0_i32, %c0_i32_0 : i32, i32, i32
  }
  func.func @transform_10(%arg0: i32, %arg1: memref<2xi32, #tpu.memory_space<smem>>) -> (i32, i32, i32) {
    %c0_i32 = arith.constant 0 : i32
    %c0_i32_0 = arith.constant 0 : i32
    %c0_i32_1 = arith.constant 0 : i32
    return %arg0, %c0_i32, %c0_i32_0 : i32, i32, i32
  }
  func.func @transform_11(%arg0: i32, %arg1: memref<2xi32, #tpu.memory_space<smem>>) -> (i32, i32, i32) {
    %c0_i32 = arith.constant 0 : i32
    %c0_i32_0 = arith.constant 0 : i32
    %c0_i32_1 = arith.constant 0 : i32
    return %arg0, %c0_i32, %c0_i32_0 : i32, i32, i32
  }
  func.func @transform_12(%arg0: i32, %arg1: memref<2xi32, #tpu.memory_space<smem>>) -> (i32, i32, i32) {
    %c0_i32 = arith.constant 0 : i32
    %c0_i32_0 = arith.constant 0 : i32
    %c0_i32_1 = arith.constant 0 : i32
    return %arg0, %c0_i32, %c0_i32_0 : i32, i32, i32
  }
}

</mosaic_0001>

<bundles_post_ra>
// kernel: tpu_custom_call.1
= control target key start
LH: loop header
LB: loop body
LE: loop exit
PB: predicated region body
PF: predicated region fallthrough
CT: control target
= control target key end

     0   :  { %s2684_s0 = inlined_call_operand.hbm [shape: s32[2], index: 0, kind: input, shape index: {}]   ;;  %s2685_s1 = inlined_call_operand.vmem [shape: bf16[2,128,32], index: 1, kind: input, shape index: {}]   ;;  %s2686_s2 = inlined_call_operand.hbm [shape: bf16[2,8,32], index: 2, kind: input, shape index: {}]   ;;  %s2687_s3 = inlined_call_operand.vmem [shape: bf16[32,128], index: 3, kind: input, shape index: {}]   ;;  %s2688_s4 = inlined_call_operand.vmem [shape: f32[1,128], index: 4, kind: input, shape index: {}]   ;;  %s2689_s5 = inlined_call_operand.vmem [shape: bf16[32,128], index: 5, kind: input, shape index: {}]   ;;  %s2690_s6 = inlined_call_operand.vmem [shape: f32[1,128], index: 6, kind: input, shape index: {}]   ;;  %s2691_s7 = inlined_call_operand.vmem [shape: bf16[128,128], index: 7, kind: input, shape index: {}]   ;;  %s2692_s8 = inlined_call_operand.vmem [shape: bf16[128,128], index: 8, kind: input, shape index: {}]   ;;  %s2693_s9 = inlined_call_operand.vmem [shape: f32[1,128], index: 9, kind: input, shape index: {}]   ;;  %s2694_s10 = inlined_call_operand.hbm [shape: f32[2,8,128], index: 10, kind: output, shape index: {0}]   ;;  %s2695_s11 = inlined_call_operand.hbm [shape: f32[2,8,128], index: 11, kind: output, shape index: {1}]   ;;  %s2696_s12 = inlined_call_operand.hbm [shape: f32[2,128,128], index: 12, kind: output, shape index: {2}]   ;;  %s2697_s13 = inlined_call_operand.hbm [shape: f32[2,1,128], index: 13, kind: output, shape index: {3}]  }
   0x1   :  { %2705 = sst [smem:[#allocation21_spill]] %s2685_s1  ;;  %s1880_s27 = scalar_lea.hbm %s2684_s0, 16 }
   0x2   :  { %2706 = sst [smem:[#allocation22_spill]] %s2686_s2  ;;  %p1881_p0 = scmp.ne.s32.totalorder %s2684_s0, %s1880_s27 }
   0x3   :  { %2707 = sst [smem:[#allocation23_spill]] %s2687_s3  ;;  %p1884_p1 = scmp.lt.u32.totalorder %s1880_s27, %s2684_s0 }
   0x4   :  { %2708 = sst [smem:[#allocation24_spill]] %s2688_s4 }
   0x5   :  { %2709 = sst [smem:[#allocation25_spill]] %s2689_s5  ;;  %p1886_p2 = pnand %p1884_p1, %p1881_p0 }
   0x7   :  { %1889 = shalt.err (!%p1886_p2)  }
   0x8   :  { %s2082_s15 = smov [#allocation3]  }
   0x9   :  { %20 = dma.hbm_to_smem %s2684_s0, 16, %s2082_s15, [#allocation2] }
   0xa   :  { %2048 = dma.done.wait [#allocation2], 16 }
   0xb   :  { %2049 = vsyncadd [#allocation2], 4294967280 }
   0xc   :  { %22 = sfence }
   0xd   :  { %23 = vsyncpa [#allocation5], 0 }
   0xe   :  { %25 = vsyncpa [#allocation5 + $0x1], 0 }
   0xf   :  { %26 = vsyncpa [#allocation6], 0 }
  0x10   :  { %28 = vsyncpa [#allocation6 + $0x1], 0 }
  0x11   :  { %29 = vsyncpa [#allocation9], 0 }
  0x12   :  { %31 = vsyncpa [#allocation9 + $0x1], 0 }
  0x13   :  { %32 = vsyncpa [#allocation12], 0 }
  0x14   :  { %34 = vsyncpa [#allocation12 + $0x1], 0  ;;  %s2177_s18 = smov 0   ;;  %s2179_s19 = smov 0  }
  0x15   :  { %s2181_s20 = smov 0   ;;  %s2183_s21 = smov 0  }
  0x16 LB: > { %2710 = sst [smem:[#allocation18_spill]] %s2076_s20  ;;  %s2198_s0 = sadd.s32 4294967295, %s2080_s21   ;;  %s2080_s21 = sphi %s2183_s21, %s2733_s21   ;;  %s2076_s20 = sphi %s2181_s20, %s2735_s20   ;;  %s2072_s19 = sphi %s2179_s19, %s2737_s19   ;;  %s2068_s18 = sphi %s2177_s18, %s2736_s18  }
  0x17   : > { %s2698_s22 = sadd.s32 4294967294, %s2080_s21   ;;  %s2202_s23 = sadd.s32 1, %s2080_s21  }
  0x18   : > { %2711 = sst [smem:[#allocation19_spill]] %s2202_s23  ;;  %s73_s24 = sadd.s32 1, %s2076_s20 }
  0x19   : > { %s70_s25 = ssub.s32 %s2080_s21, %s2202_s23  ;;  %p80_p3 = scmp.ne.s32.totalorder %s2076_s20, %s2072_s19 }
  0x1a   : > { %p71_p4 = scmp.eq.s32.totalorder %s70_s25, 0  ;;  %p81_p5 = scmp.eq.s32.totalorder %s2080_s21, 0 }
  0x1b   : > { %p86_p6 = scmp.ne.s32.totalorder %s2072_s19, %s2068_s18  ;;  %p87_p7 = scmp.eq.s32.totalorder %s2198_s0, 0 }
  0x1c   : > { %s2214_s26 = scalar_select %p71_p4, %s2076_s20, %s73_s24  }
  0x1d   : > { %p2216_p8 = por %p81_p5, %p80_p3  ;;  %p2220_p9 = por %p87_p7, %p86_p6 }
  0x1e   : > { %2712 = sst [smem:[#allocation20_spill]] %s2214_s26  ;;  %p257_p10 = scmp.eq.s32.totalorder %s2198_s0, 1 }
  0x1f   : > { %p263_p11 = scmp.eq.s32.totalorder %s2698_s22, 1  ;;  %p1768_p13 = scmp.lt.s32.totalorder %s2080_s21, 2 }
  0x20   : > { %p2229_p0 = por %p257_p10, %p80_p3  ;;  %s390_s14 = sand.u32 1, %s2076_s20  }
  0x21   : > { %p2233_p1 = por %p263_p11, %p86_p6  ;;  %s1444_s15 = sshll.u32 %s2080_s21, 6 }
  0x22   : > { %s2715_s29 = scalar_select %p2229_p0, 1, 0 }
  0x23   : > { %s2716_s30 = scalar_select %p2233_p1, 1, 0 }
  0x24   : > { %s1443_s16 = sshll.u32 %s390_s14, 2  ;;  %s2717_s2 = sld [smem:[#allocation22_spill]] }
  0x25   : > { %s394_s22 = scalar_lea.vmem [#allocation4], %s1443_s16  ;;  %p2246_p2 = pnand %p1768_p13, %p2216_p8 }
  0x26   : > { %s401_s26 = sshll.u32 %s394_s22, 4  ;;  %s391_s17 = scalar_lea.sflag [#allocation5], %s390_s14  ;;  %s2250_s26 = int_to_ptr.vmem [resolvable:$true] %s401_s26 }
  0x27   : > { %p1892_p6 = pneg %p2246_p2 }
  0x2a   : > { %s2242_s25 = scalar_lea.hbm %s2717_s2, %s1444_s15  ;;  %s1895_s16 = scalar_lea.hbm %s2717_s2, 128 }
  0x2b   : > { %s1890_s15 = scalar_lea.hbm %s2242_s25, 64  ;;  %p1896_p8 = scmp.lt.u32.totalorder %s2242_s25, %s2717_s2 }
  0x2c   : > { %p1891_p5 = scmp.ne.s32.totalorder %s2242_s25, %s1890_s15  ;;  %p1897_p11 = scmp.lt.u32.totalorder %s1895_s16, %s1890_s15 }
  0x2d   : > { %p1899_p12 = scmp.lt.u32.totalorder %s1890_s15, %s2242_s25 }
  0x2e   : > { %p1893_p7 = pnand %p1892_p6, %p1891_p5  ;;  %p1898_p13 = por %p1897_p11, %p1896_p8 }
  0x30   : > { %p1894_p10 = pneg %p1893_p7  ;;  %p1900_p3 = por %p1899_p12, %p1898_p13 }
  0x32   : > { %p1901_p4 = pnand %p1900_p3, %p1894_p10 }
  0x34   : > { %1904 = shalt.err (!%p1901_p4)
}
  0x35   : > { %s1905_s14 = scalar_lea.vmem %s2250_s26, 64  ;;  %s2083_s22 = smov [#allocation4]  }
  0x36   : > { %p1906_p5 = scmp.ne.s32.totalorder %s2250_s26, %s1905_s14  ;;  %s1910_s27 = sshll.u32 %s2083_s22, 4  ;;  %s1911_s27 = int_to_ptr.vmem [resolvable:$false] %s1910_s27 }
  0x37   : > { %s1912_s20 = scalar_lea.vmem %s1911_s27, 128  ;;  %p1913_p0 = scmp.lt.s32.totalorder %s2250_s26, %s1911_s27 }
  0x38   : > { %p1908_p7 = pnand %p1906_p5, %p1892_p6  ;;  %p1914_p8 = scmp.lt.s32.totalorder %s1912_s20, %s1905_s14 }
  0x3a   : > { %p1909_p1 = pneg %p1908_p7  ;;  %p1915_p11 = por %p1914_p8, %p1913_p0 }
  0x3c   : > { %p1916_p12 = pnand %p1915_p11, %p1909_p1 }
  0x3e   : > { %1919 = shalt.err (!%p1916_p12)
}
  0x3f   : > { %1754 = dma.hbm_to_vmem [thread:$0]  (!%p2246_p2), %s2242_s25, 64, %s2250_s26, %s391_s17  }
  0x40   : > { %p2719_p3 = scmp.lt.s32.totalorder %s2080_s21, 3  ;;  %p2720_p4 = scmp.ge.s32.totalorder %s2080_s21, 1 }
  0x42   : > { %p407_p6 = pnand %p2720_p4, %p2719_p3 }
  0x43   : > { %s2284_s15 = sand.u32 (!%p407_p6), 1, %s2072_s19  }
  0x44   : > { %410 = sbr.rel (%p407_p6) target bundleno = 1367 (0x557), region = 56  ;;  %s1446_s16 = sshll.u32 (!%p407_p6), %s2284_s15, 2 }
  0x45   : > { %s413_s24 = scalar_lea.sflag (!%p407_p6), [#allocation5], %s2284_s15  ;;  %s2288_s14 = scalar_lea.vmem (!%p407_p6), [#allocation4], %s1446_s16 }
  0x4b   : > { %2051 = dma.done.wait (%p2220_p9), %s413_s24, 64  }
  0x4c   : > { %2053 = vsyncadd (%p2220_p9), %s413_s24, 4294967232  ;;  %p476_p0 = scmp.lt.s32.totalorder %s2198_s0, 1  ;;  %v2084_v0 = vmov 0.0   ;;  %vm2085_vm0 = vmmov 0   ;;  %s2721_s1 = sld [smem:[#allocation21_spill]]  ;;  %vm562_vm1 = vcmask 261120  }
  0x4d   : > { %1592 = vmatprep.subr.bf16.mxu1 %v2084_v0  ;;  %1596 = vmatprep.mubr.msk.bf16.mxu1 %vm2085_vm0, %v2084_v0  ;;  %s2722_s3 = sld [smem:[#allocation23_spill]]  ;;  %s2723_s5 = sld [smem:[#allocation25_spill]]  ;;  %v700_v10 = vld [vmem:[%s2288_s14] sm:$0xf]  ;;  %vm1165_vm4 = vcmask 1040384  }
  0x4e   : > { %s477_s23 = scalar_select %p476_p0, %s2198_s0, 1 }
  0x4f   : > { %s2724_s4 = sld [smem:[#allocation24_spill]]  ;;  %s2703_s14 = sshll.u32 %s2284_s15, 3 }
  0x50   : > { %s1504_s26 = sshll.u32 %s477_s23, 6  ;;  %s482_s16 = sld [smem:[#allocation3 + %s2198_s0]] }
  0x51   : > { %s2485_s28 = scalar_lea.vmem [#allocation8], %s2703_s14  ;;  %s1204_s23 = sand.u32 1, %s2198_s0  }
  0x52   : > { %s2302_s22 = scalar_lea.vmem %s2721_s1, %s1504_s26  ;;  %s2704_s26 = sshll.u32 %s2198_s0, 7 }
  0x53   : > { %v1810_v1 = vld [vmem:[%s2722_s3] sm:$0xff]   ;;  %v1811_v2 = vld [vmem:[%s2722_s3 + $0x8] sm:$0xff]   ;;  %v1814_v5 = vld [vmem:[%s2302_s22 + $0x10] sm:$0xff]   ;;  %s1240_s14 = sshll.u32 %s2485_s28, 4  ;;  %s2547_s1 = scalar_lea.sflag [#allocation9], %s1204_s23  ;;  %s1241_s14 = int_to_ptr.vmem [resolvable:$true] %s1240_s14 }
  0x54   : > { %1572 = vmatprep.subr.bf16.mxu0 %v1810_v1  ;;  %v1812_v3 = vld [vmem:[%s2302_s22] sm:$0xff]   ;;  %v1813_v4 = vld [vmem:[%s2302_s22 + $0x8] sm:$0xff]   ;;  %v1815_v7 = vld [vmem:[%s2302_s22 + $0x18] sm:$0xff]   ;;  %s1920_s2 = scalar_lea.vmem %s1241_s14, 128  ;;  %p2727_p1 = scmp.ne.s32.totalorder %s2715_s29, 0 }
  0x55   : > { %1573 = vmatpush3.bf16.msra.mxu0 %v1810_v1  ;;  %1576 = vmatprep.mubr.msk.bf16.mxu0 %vm562_vm1, %v1812_v3  ;;  %v1820_v6 = vld [vmem:[%s2723_s5] sm:$0xff]   ;;  %v1821_v8 = vld [vmem:[%s2723_s5 + $0x8] sm:$0xff]   ;;  %v1818_v12 = vld [vmem:[%s2302_s22 + $0x30] sm:$0xff]   ;;  %p1921_p9 = scmp.ne.s32.totalorder %s1241_s14, %s1920_s2 }
  0x56   : > { %1574 = vmatprep.subr.bf16.mxu0 %v1811_v2  ;;  %1593 = vmatpush3.bf16.msra.mxu1 %v1820_v6  ;;  %v1816_v9 = vld [vmem:[%s2302_s22 + $0x20] sm:$0xff]   ;;  %v1817_v11 = vld [vmem:[%s2302_s22 + $0x28] sm:$0xff]   ;;  %v1819_v13 = vld [vmem:[%s2302_s22 + $0x38] sm:$0xff]   ;;  %s1449_s22 = sshll.u32 %s2284_s15, 7 }
  0x57   : > { %1594 = vmatprep.subr.bf16.mxu1 %v2084_v0  ;;  %v2344_v14 = vld [vmem:[%s2724_s4] ss:$0 sm:$0xff]  ;;  %s2357_s27 = scalar_lea.vmem [#allocation10], %s1449_s22  ;;  %s2544_s22 = scalar_lea.hbm %s2695_s11, %s2704_s26 }
  0x58   : > { %p1922_p2 = pnand %p1921_p9, %p2727_p1 }
  0x59   : > { %1575 = vmatpush3.bf16.msra.mxu0 %v1811_v2 }
  0x5a   : > { %1600 = vmatprep.subr.bf16.mxu0 %v2084_v0  ;;  %1595 = vmatpush3.bf16.msra.mxu1 %v1821_v8  ;;  %p1923_p10 = pneg %p1922_p2 }
  0x5b   : > { %1620 = vmatprep.subr.bf16.mxu1 %v2084_v0 }
  0x5c   : > { %1577 = vmatmul.mubr.msk.bf16.vlgmr.msra.gmra.mrb[0].mxu0 %vm562_vm1, %v1813_v4 }
  0x5d   : > { %1580 = vmatprep.mubr.msk.bf16.mxu0 %vm562_vm1, %v1814_v5  ;;  %1597 = vmatmul.mubr.msk.bf16.vlgmr.msra.gmra.mrb[0].mxu1 %vm562_vm1, %v700_v10 }
  0x5e   : > { %1636 = vmatprep.mubr.msk.bf16.mxu1 %vm2085_vm0, %v2084_v0 }
  0x64   : > { %1581 = vmatmul.mubr.msk.bf16.gmra.mrb[4].mxu0 %vm562_vm1, %v1815_v7 }
  0x65   : > { %1584 = vmatprep.mubr.msk.bf16.mxu0 %vm562_vm1, %v1816_v9 }
  0x6c   : > { %1585 = vmatmul.mubr.msk.bf16.gmra.mrb[8].mxu0 %vm562_vm1, %v1817_v11 }
  0x6d   : > { %1588 = vmatprep.mubr.msk.bf16.mxu0 %vm562_vm1, %v1818_v12  ;;  %v1471_v12 = vld [vmem:[%s2690_s6] ss:$0 sm:$0xff] }
  0x74   : > { %1589 = vmatmul.mubr.msk.bf16.gmra.mrb[12].mxu0 %vm562_vm1, %v1819_v13 }
  0x75   : > { %1616 = vmatprep.mubr.msk.bf16.mxu0 %vm2085_vm0, %v2084_v0 }
 0x12f   : > { %v1578_v15 = vpop.f32.mrb[0].mxu0 }
 0x130   : > { %v630_v16 = vadd.f32 %v1578_v15, %v2344_v14  ;;  %v621_v17 = vpop.f32.mrb[1].mxu0  ;;  %v2352_v26 = vpop.f32.mrb[0].mxu1 }
 0x131   : > { %v622_v18 = vadd.f32 %v2344_v14, %v621_v17  ;;  %v1579_v19 = vpop.f32.mrb[2].mxu0  ;;  %v1598_v29 = vpop.f32.mrb[1].mxu1  ;;  %v762_v13 = vadd.f32 %v1471_v12, %v2352_v26 }
 0x132   : > { %1838 = vtanh.f32 %v630_v16  ;;  %v633_v20 = vadd.f32 %v1579_v19, %v2344_v14  ;;  %v624_v21 = vpop.f32.mrb[3].mxu0  ;;  %v764_v32 = vpop.f32.mrb[2].mxu1  ;;  %v817_v16 = vlaneseq }
 0x133   : > { %1840 = vtanh.f32 %v622_v18  ;;  %v625_v22 = vadd.f32 %v2344_v14, %v624_v21  ;;  %v1599_v34 = vpop.f32.mrb[3].mxu1  ;;  %v819_v18 = vstv %s482_s16  ;;  %v1832_v32 = vld [vmem:[%s2691_s7 + $0x10] sm:$0xff]   ;;  %s2088_s16 = smov 1.0  }
 0x134   : > { %1842 = vtanh.f32 %v633_v20  ;;  %v818_v17 = vand.u32 127, %v817_v16  ;;  %v1834_v34 = vld [vmem:[%s2691_s7 + $0x20] sm:$0xff]  }
 0x135   : > { %1844 = vtanh.f32 %v625_v22 }
 0x136   : > { %vm2441_vm2 = vcmp.lt.s32.totalorder %v818_v17, %v819_v18 }
 0x137   : > { %v1582_v23 = vpop.f32.mrb[4].mxu0  ;;  %v2448_v20 = vsel %vm2441_vm2, 1.0, %v2084_v0 }
 0x138   : > { %v646_v24 = vadd.f32 %v1582_v23, %v2344_v14  ;;  %v637_v25 = vpop.f32.mrb[5].mxu0  ;;  %vm823_vm3 = vcmp.gt.f32.partialorder %v2448_v20, 0.0 }
 0x139   : > { %v638_v27 = vadd.f32 %v2344_v14, %v637_v25  ;;  %v1583_v28 = vpop.f32.mrb[6].mxu0 }
 0x13a   : > { %1846 = vtanh.f32 %v646_v24  ;;  %v649_v30 = vadd.f32 %v1583_v28, %v2344_v14  ;;  %v640_v31 = vpop.f32.mrb[7].mxu0 }
 0x13b   : > { %1848 = vtanh.f32 %v638_v27  ;;  %v641_v33 = vadd.f32 %v2344_v14, %v640_v31  ;;  %v1831_v31 = vld [vmem:[%s2691_s7 + $0x8] sm:$0xff]  }
 0x13c   : > { %v1839_v35 = vpop.eup %1838  ;;  %1850 = vtanh.f32 %v649_v30  ;;  %v1830_v30 = vld [vmem:[%s2691_s7] sm:$0xff]  }
 0x13d   : > { %v1841_v36 = vpop.eup %1840  ;;  %1184 = vst [vmem:[%s2357_s27 + $0x10] sm:$0xff] %v1839_v35  ;;  %1852 = vtanh.f32 %v641_v33  ;;  %v1833_v33 = vld [vmem:[%s2691_s7 + $0x18] sm:$0xff]  }
 0x13e   : > { %v1843_v37 = vpop.eup %1842  ;;  %1182 = vst [vmem:[%s2357_s27] sm:$0xff] %v1841_v36 }
 0x13f   : > { %v1845_v38 = vpop.eup %1844  ;;  %1185 = vst [vmem:[%s2357_s27 + $0x18] sm:$0xff] %v1843_v37  ;;  %v2362_v39 = vpack.c.bf16 %v1843_v37, %v1839_v35  ;;  %v1586_v40 = vpop.f32.mrb[8].mxu0  ;;  %v1835_v35 = vld [vmem:[%s2691_s7 + $0x28] sm:$0xff]  }
 0x140   : > { %1183 = vst [vmem:[%s2357_s27 + $0x8] sm:$0xff] %v1845_v38  ;;  %v2365_v41 = vpack.c.bf16 %v1845_v38, %v1841_v36  ;;  %v662_v42 = vadd.f32 %v1586_v40, %v2344_v14  ;;  %v653_v43 = vpop.f32.mrb[9].mxu0  ;;  %v1836_v36 = vld [vmem:[%s2691_s7 + $0x30] sm:$0xff]  }
 0x141   : > { %v654_v44 = vadd.f32 %v2344_v14, %v653_v43  ;;  %v1587_v45 = vpop.f32.mrb[10].mxu0 }
 0x142   : > { %1601 = vmatpush3.bf16.xpose.msra.mxu0 %v2365_v41  ;;  %1621 = vmatpush3.bf16.msra.mxu1 %v2365_v41  ;;  %1854 = vtanh.f32 %v662_v42  ;;  %v665_v46 = vadd.f32 %v1587_v45, %v2344_v14  ;;  %v656_v47 = vpop.f32.mrb[11].mxu0  ;;  %v1822_v42 = vld [vmem:[%s2692_s8] sm:$0xff]   ;;  %v1824_v45 = vld [vmem:[%s2692_s8 + $0x10] sm:$0xff]  }
 0x143   : > { %1622 = vmatprep.subr.bf16.mxu1 %v2084_v0  ;;  %1856 = vtanh.f32 %v654_v44  ;;  %1602 = vmatprep.subr.bf16.mxu0 %v2084_v0  ;;  %v657_v48 = vadd.f32 %v2344_v14, %v656_v47  ;;  %v1823_v44 = vld [vmem:[%s2692_s8 + $0x8] sm:$0xff]   ;;  %v1826_v47 = vld [vmem:[%s2692_s8 + $0x20] sm:$0xff]  }
 0x144   : > { %v1847_v49 = vpop.eup %1846  ;;  %1858 = vtanh.f32 %v665_v46  ;;  %v1825_v46 = vld [vmem:[%s2692_s8 + $0x18] sm:$0xff]  }
 0x145   : > { %v1849_v50 = vpop.eup %1848  ;;  %1188 = vst [vmem:[%s2357_s27 + $0x30] sm:$0xff] %v1847_v49  ;;  %1860 = vtanh.f32 %v657_v48  ;;  %v1827_v48 = vld [vmem:[%s2692_s8 + $0x28] sm:$0xff]  }
 0x146   : > { %v1851_v51 = vpop.eup %1850  ;;  %1186 = vst [vmem:[%s2357_s27 + $0x20] sm:$0xff] %v1849_v50  ;;  %1623 = vmatpush3.bf16.msra.mxu1 %v2362_v39 }
 0x147   : > { %v1853_v52 = vpop.eup %1852  ;;  %1189 = vst [vmem:[%s2357_s27 + $0x38] sm:$0xff] %v1851_v51  ;;  %1624 = vmatprep.subr.bf16.mxu1 %v2084_v0  ;;  %v2380_v53 = vpack.c.bf16 %v1851_v51, %v1847_v49  ;;  %v1590_v54 = vpop.f32.mrb[12].mxu0  ;;  %v1828_v49 = vld [vmem:[%s2692_s8 + $0x30] sm:$0xff]   ;;  %v2086_v51 = vmov 0.0|0.0  }
 0x148   : > { %1187 = vst [vmem:[%s2357_s27 + $0x28] sm:$0xff] %v1853_v52  ;;  %v2383_v55 = vpack.c.bf16 %v1853_v52, %v1849_v50  ;;  %v678_v56 = vadd.f32 %v1590_v54, %v2344_v14  ;;  %v669_v57 = vpop.f32.mrb[13].mxu0  ;;  %v1829_v50 = vld [vmem:[%s2692_s8 + $0x38] sm:$0xff]  }
 0x149   : > { %v670_v58 = vadd.f32 %v2344_v14, %v669_v57  ;;  %v1591_v59 = vpop.f32.mrb[14].mxu0 }
 0x14a   : > { %1603 = vmatpush3.bf16.xpose.msra.mxu0 %v2362_v39  ;;  %1625 = vmatpush3.bf16.msra.mxu1 %v2383_v55  ;;  %1862 = vtanh.f32 %v678_v56  ;;  %v681_v60 = vadd.f32 %v1591_v59, %v2344_v14  ;;  %v672_v61 = vpop.f32.mrb[15].mxu0 }
 0x14b   : > { %1626 = vmatprep.subr.bf16.mxu1 %v2084_v0  ;;  %1604 = vmatprep.subr.bf16.mxu0 %v2084_v0  ;;  %1864 = vtanh.f32 %v670_v58  ;;  %v673_v62 = vadd.f32 %v2344_v14, %v672_v61 }
 0x14c   : > { %v1855_v63 = vpop.eup %1854  ;;  %1866 = vtanh.f32 %v681_v60 }
 0x14d   : > { %v1857_v1 = vpop.eup %1856  ;;  %1192 = vst [vmem:[%s2357_s27 + $0x50] sm:$0xff] %v1855_v63  ;;  %1868 = vtanh.f32 %v673_v62 }
 0x14e   : > { %v1859_v2 = vpop.eup %1858  ;;  %1190 = vst [vmem:[%s2357_s27 + $0x40] sm:$0xff] %v1857_v1  ;;  %1627 = vmatpush3.bf16.msra.mxu1 %v2380_v53  ;;  %1870 = vtanh.f32 %v762_v13 }
 0x14f   : > { %v1861_v3 = vpop.eup %1860  ;;  %1193 = vst [vmem:[%s2357_s27 + $0x58] sm:$0xff] %v1859_v2  ;;  %1628 = vmatprep.subr.bf16.mxu1 %v2084_v0  ;;  %v2398_v4 = vpack.c.bf16 %v1859_v2, %v1855_v63 }
 0x150   : > { %1191 = vst [vmem:[%s2357_s27 + $0x48] sm:$0xff] %v1861_v3  ;;  %v2401_v5 = vpack.c.bf16 %v1861_v3, %v1857_v1 }
 0x152   : > { %1605 = vmatpush3.bf16.xpose.msra.mxu0 %v2383_v55  ;;  %1629 = vmatpush3.bf16.msra.mxu1 %v2401_v5 }
 0x153   : > { %1606 = vmatprep.subr.bf16.mxu0 %v2084_v0  ;;  %1630 = vmatprep.subr.bf16.mxu1 %v2084_v0 }
 0x154   : > { %v1863_v6 = vpop.eup %1862 }
 0x155   : > { %v1865_v7 = vpop.eup %1864  ;;  %1196 = vst [vmem:[%s2357_s27 + $0x70] sm:$0xff] %v1863_v6 }
 0x156   : > { %v1867_v8 = vpop.eup %1866  ;;  %1194 = vst [vmem:[%s2357_s27 + $0x60] sm:$0xff] %v1865_v7  ;;  %1631 = vmatpush3.bf16.msra.mxu1 %v2398_v4 }
 0x157   : > { %v1869_v9 = vpop.eup %1868  ;;  %1197 = vst [vmem:[%s2357_s27 + $0x78] sm:$0xff] %v1867_v8  ;;  %1632 = vmatprep.subr.bf16.mxu1 %v2084_v0  ;;  %v2412_v10 = vpack.c.bf16 %v1867_v8, %v1863_v6 }
 0x158   : > { %1195 = vst [vmem:[%s2357_s27 + $0x68] sm:$0xff] %v1869_v9  ;;  %v2415_v11 = vpack.c.bf16 %v1869_v9, %v1865_v7  ;;  %v1871_v14 = vpop.eup %1870 }
 0x159   : > { %v2435_v15 = vpack.c.bf16 %v1871_v14, %v1871_v14 }
 0x15a   : > { %1607 = vmatpush3.bf16.xpose.msra.mxu0 %v2380_v53  ;;  %1633 = vmatpush3.bf16.msra.mxu1 %v2415_v11 }
 0x15b   : > { %1608 = vmatprep.subr.bf16.mxu0 %v2084_v0  ;;  %1634 = vmatprep.subr.bf16.mxu1 %v2084_v0 }
 0x15e   : > { %1635 = vmatpush3.bf16.msra.mxu1 %v2412_v10 }
 0x15f   : > { %1640 = vmatprep.subr.bf16.mxu1 %v2084_v0 }
 0x162   : > { %1609 = vmatpush3.bf16.xpose.msra.mxu0 %v2401_v5 }
 0x163   : > { %1610 = vmatprep.subr.bf16.mxu0 %v2084_v0 }
 0x16a   : > { %1611 = vmatpush3.bf16.xpose.msra.mxu0 %v2398_v4 }
 0x16b   : > { %1612 = vmatprep.subr.bf16.mxu0 %v2084_v0 }
 0x172   : > { %1613 = vmatpush3.bf16.xpose.msra.mxu0 %v2415_v11 }
 0x173   : > { %1614 = vmatprep.subr.bf16.mxu0 %v2084_v0 }
 0x17a   : > { %1615 = vmatpush3.bf16.xpose.msra.mxu0 %v2412_v10 }
 0x17b   : > { %1660 = vmatprep.subr.bf16.mxu0 %v2084_v0 }
 0x181   : > { %1617 = vmatmul.mubr.bf16.vlgmr.msra.gmra.mrb[16].mxu0 %v2435_v15 }
 0x182   : > { %1676 = vmatprep.mubr.msk.bf16.mxu0 %vm2085_vm0, %v2084_v0  ;;  %1661 = vmatpush3.bf16.msra.mxu0 %v1830_v30 }
 0x183   : > { %1662 = vmatprep.subr.bf16.mxu0 %v2084_v0 }
 0x186   : > { %1663 = vmatpush3.bf16.msra.mxu0 %v1831_v31 }
 0x187   : > { %1664 = vmatprep.subr.bf16.mxu0 %v2084_v0 }
 0x18a   : > { %1665 = vmatpush3.bf16.msra.mxu0 %v1832_v32 }
 0x18b   : > { %1666 = vmatprep.subr.bf16.mxu0 %v2084_v0 }
 0x18e   : > { %1667 = vmatpush3.bf16.msra.mxu0 %v1833_v33 }
 0x18f   : > { %1668 = vmatprep.subr.bf16.mxu0 %v2084_v0 }
 0x192   : > { %1669 = vmatpush3.bf16.msra.mxu0 %v1834_v34 }
 0x193   : > { %1670 = vmatprep.subr.bf16.mxu0 %v2084_v0 }
 0x196   : > { %1671 = vmatpush3.bf16.msra.mxu0 %v1835_v35 }
 0x197   : > { %1672 = vmatprep.subr.bf16.mxu0 %v2084_v0 }
 0x19a   : > { %1673 = vmatpush3.bf16.msra.mxu0 %v1836_v36 }
 0x19b   : > { %1674 = vmatprep.subr.bf16.mxu0 %v2084_v0 }
 0x254   : > { %v811_v21 = vpop.f32.mrb[16].mxu0 }
 0x255   : > { %v1618_v22 = vpop.f32.mrb[17].mxu0  ;;  %v826_v23 = vsel %vm823_vm3, %v811_v21, -1e+30 }
 0x256   : > { %v814_v24 = vpop.f32.mrb[18].mxu0  ;;  %827 = vmax.xlane.f32.xlu0 %v826_v23 }
 0x257   : > { %v1619_v25 = vpop.f32.mrb[19].mxu0 }
 0x2e3   : > { %v828_v26 = vpop.xlane.xlu0 %827 }
 0x2e4   : > { %v829_v27 = vsub.f32 %v826_v23, %v828_v26 }
 0x2e6   : > { %v830_v28 = vmul.f32 1.442695, %v829_v27 }
 0x2e8   : > { %1872 = vpow2.f32 %v830_v28 }
 0x2f2   : > { %v1873_v29 = vpop.eup %1872 }
 0x2f3   : > { %832 = vadd.xlane.f32.xlu0 %v1873_v29 }
 0x380   : > { %v833_v37 = vpop.xlane.xlu0 %832 }
 0x381   : > { %1874 = vrcp.f32 %v833_v37 }
 0x38b   : > { %v1875_v38 = vpop.eup %1874 }
 0x38c   : > { %v835_v40 = vmul.f32 %v1875_v38, %v1873_v29 }
 0x38e   : > { %v836_v43 = vpack.c.bf16 %v835_v40, %v835_v40  ;;  %1181 = vst [vmem:[%s2485_s28] sm:$0xff] %v835_v40 }
 0x390   : > { %1637 = vmatmul.mubr.bf16.vlgmr.msra.gmra.mrb[4].mxu1 %v836_v43 }
 0x391   : > { %1641 = vmatpush3.bf16.msra.mxu1 %v1822_v42  ;;  %1656 = vmatprep.mubr.msk.bf16.mxu1 %vm2085_vm0, %v2084_v0 }
 0x392   : > { %1642 = vmatprep.subr.bf16.mxu1 %v2084_v0 }
 0x395   : > { %1643 = vmatpush3.bf16.msra.mxu1 %v1823_v44 }
 0x396   : > { %1644 = vmatprep.subr.bf16.mxu1 %v2084_v0 }
 0x399   : > { %1645 = vmatpush3.bf16.msra.mxu1 %v1824_v45 }
 0x39a   : > { %1646 = vmatprep.subr.bf16.mxu1 %v2084_v0 }
 0x39d   : > { %1647 = vmatpush3.bf16.msra.mxu1 %v1825_v46 }
 0x39e   : > { %1648 = vmatprep.subr.bf16.mxu1 %v2084_v0 }
 0x3a1   : > { %1649 = vmatpush3.bf16.msra.mxu1 %v1826_v47 }
 0x3a2   : > { %1650 = vmatprep.subr.bf16.mxu1 %v2084_v0 }
 0x3a5   : > { %1651 = vmatpush3.bf16.msra.mxu1 %v1827_v48 }
 0x3a6   : > { %1652 = vmatprep.subr.bf16.mxu1 %v2084_v0 }
 0x3a9   : > { %1653 = vmatpush3.bf16.msra.mxu1 %v1828_v49 }
 0x3aa   : > { %1654 = vmatprep.subr.bf16.mxu1 %v2084_v0 }
 0x3ad   : > { %1655 = vmatpush3.bf16.msra.mxu1 %v1829_v50 }
 0x3ae   : > { %1715 = vmatprep.subr.bf16.mxu1 %v2086_v51 }
 0x3b0   : > { %1657 = vmatmul.mubr.bf16.vlgmr.msra.gmra.mrb[8].mxu1 %v2435_v15 }
 0x3b1   : > { %1717 = vmatpush3.bf16.msra.mxu1 %v2365_v41  ;;  %1712 = vmatprep.mubr.msk.f32.mxu1 %vm2085_vm0, %v2084_v0  ;;  %v1837_v0 = vld [vmem:[%s2691_s7 + $0x38] sm:$0xff]   ;;  %v2087_v41 = vmov 1.0  }
 0x3b2   : > { %1718 = vmatprep.subr.bf16.mxu1 %v2086_v51  ;;  %1675 = vmatpush3.bf16.msra.mxu0 %v1837_v0 }
 0x3b5   : > { %1720 = vmatpush3.bf16.msra.mxu1 %v2362_v39  ;;  %v1166_v39 = vsel %vm1165_vm4, %v2448_v20, 0.0 }
 0x3b6   : > { %1721 = vmatprep.subr.bf16.mxu1 %v2086_v51  ;;  %1167 = vadd.xlane.f32.xlu1 %v1166_v39 }
 0x3b9   : > { %1723 = vmatpush3.bf16.msra.mxu1 %v2383_v55 }
 0x3ba   : > { %1724 = vmatprep.subr.bf16.mxu1 %v2086_v51 }
 0x3bd   : > { %1726 = vmatpush3.bf16.msra.mxu1 %v2380_v53 }
 0x3be   : > { %1727 = vmatprep.subr.bf16.mxu1 %v2086_v51 }
 0x3c1   : > { %1729 = vmatpush3.bf16.msra.mxu1 %v2401_v5 }
 0x3c2   : > { %1730 = vmatprep.subr.bf16.mxu1 %v2086_v51 }
 0x3c5   : > { %1732 = vmatpush3.bf16.msra.mxu1 %v2398_v4 }
 0x3c6   : > { %1733 = vmatprep.subr.bf16.mxu1 %v2086_v51 }
 0x3c9   : > { %1735 = vmatpush3.bf16.msra.mxu1 %v2415_v11 }
 0x3ca   : > { %1736 = vmatprep.subr.bf16.mxu1 %v2086_v51 }
 0x3cd   : > { %1738 = vmatpush3.bf16.msra.mxu1 %v2412_v10 }
 0x3d0   : > { %1713 = vmatmul.mubr.msk.f32.vlgmr.msra.gmra.mrb[12].mxu1 %vm2441_vm2, %v2087_v41 }
 0x443   : > { %v1168_v57 = vpop.xlane.xlu1 %1167 }
 0x444   : > { %v1169_v58 = vrot.slane %v1168_v57, 4 }
 0x446   : > { %v1170_v59 = vadd.f32 %v1169_v58, %v1168_v57 }
 0x448   : > { %v1171_v60 = vrot.slane %v1170_v59, 2 }
 0x44a   : > { %v1172_v61 = vadd.f32 %v1171_v60, %v1170_v59 }
 0x44c   : > { %v1173_v62 = vrot.slane %v1172_v61, 1 }
 0x44e   : > { %v1174_v63 = vadd.f32 %v1173_v62, %v1172_v61 }
 0x450   : > { %1739 = vpush %v1174_v63 }
 0x463   : > { %v871_v52 = vpop.f32.mrb[4].mxu1 }
 0x464   : > { %v877_v53 = vpack.c.bf16 %v871_v52, %v871_v52  ;;  %v1638_v54 = vpop.f32.mrb[5].mxu1 }
 0x465   : > { %v874_v55 = vpop.f32.mrb[6].mxu1 }
 0x466   : > { %v1639_v56 = vpop.f32.mrb[7].mxu1  ;;  %1677 = vmatmul.mubr.bf16.vlgmr.msra.gmra.mrb[20].mxu0 %v877_v53 }
 0x481   : > { %s1740_s20 = spop %1739 }
 0x482   : > { %s1176_s24 = smax.f32 %s2088_s16, %s1740_s20  ;;  %s2089_s20 = smov [#allocation8]  }
 0x483   : > { %v2535_v1 = vpop.f32.mrb[8].mxu1  ;;  %v1177_v5 = vstv %s1176_s24  ;;  %s1924_s16 = sshll.u32 %s2089_s20, 4  ;;  %s1925_s16 = int_to_ptr.vmem [resolvable:$false] %s1924_s16 }
 0x484   : > { %v1658_v2 = vpop.f32.mrb[9].mxu1  ;;  %1876 = vrcp.f32 %v1177_v5  ;;  %s1926_s24 = scalar_lea.vmem %s1925_s16, 256  ;;  %p1927_p13 = scmp.lt.s32.totalorder %s1241_s14, %s1925_s16 }
 0x485   : > { %v995_v3 = vpop.f32.mrb[10].mxu1  ;;  %p1928_p5 = scmp.lt.s32.totalorder %s1926_s24, %s1920_s2 }
 0x486   : > { %v1659_v4 = vpop.f32.mrb[11].mxu1 }
 0x487   : > { %p1929_p7 = por %p1928_p5, %p1927_p13 }
 0x489   : > { %p1930_p8 = pnand %p1929_p7, %p1923_p10 }
 0x48e   : > { %v1877_v8 = vpop.eup %1876 }
 0x4a3   : > { %v1161_v6 = vpop.f32.mrb[12].mxu1 }
 0x4a4   : > { %v1714_v7 = vpop.f32.mrb[13].mxu1  ;;  %v1179_v9 = vmul.f32 %v1877_v8, %v1161_v6 }
 0x4a5   : > { %1933 = shalt.err (!%p1930_p8)
}
 0x4a6   : > { %s1934_s28 = scalar_lea.hbm %s2544_s22, 128  ;;  %s1938_s17 = scalar_lea.hbm %s2695_s11, 256 }
 0x4a7   : > { %p1935_p11 = scmp.ne.s32.totalorder %s2544_s22, %s1934_s28  ;;  %p1939_p4 = scmp.lt.u32.totalorder %s2544_s22, %s2695_s11 }
 0x4a8   : > { %p1940_p6 = scmp.lt.u32.totalorder %s1938_s17, %s1934_s28  ;;  %p1942_p9 = scmp.lt.u32.totalorder %s1934_s28, %s2544_s22 }
 0x4a9   : > { %p1936_p12 = pnand %p1935_p11, %p2727_p1 }
 0x4aa   : > { %p1941_p0 = por %p1940_p6, %p1939_p4 }
 0x4ab   : > { %p1937_p3 = pneg %p1936_p12 }
 0x4ac   : > { %p1943_p2 = por %p1942_p9, %p1941_p0 }
 0x4ae   : > { %p1944_p10 = pnand %p1943_p2, %p1937_p3 }
 0x4b0   : > { %1947 = shalt.err (!%p1944_p10)
}
 0x4b1   : > { %1744 = dma.vmem_to_hbm [thread:$0]  (%p2727_p1), %s1241_s14, 128, %s2544_s22, %s2547_s1  }
 0x4b2   : > { %s475_s2 = scalar_lea.vmem [#allocation11], %s2284_s15  ;;  %s1505_s24 = sshll.u32 %s2198_s0, 11 }
 0x4b3   : > { %1198 = vst [vmem:[%s475_s2] sm:$0x1] %v1179_v9  ;;  %s2574_s28 = scalar_lea.hbm %s2696_s12, %s1505_s24  ;;  %s1253_s17 = sshll.u32 %s2357_s27, 4  ;;  %s2577_s17 = int_to_ptr.vmem [resolvable:$true] %s1253_s17 }
 0x4b4   : > { %s1948_s20 = scalar_lea.vmem %s2577_s17, 2048  ;;  %s2090_s14 = smov [#allocation10]  }
 0x4b5   : > { %p1949_p13 = scmp.ne.s32.totalorder %s2577_s17, %s1948_s20  ;;  %s1952_s22 = sshll.u32 %s2090_s14, 4  ;;  %s1953_s22 = int_to_ptr.vmem [resolvable:$false] %s1952_s22 }
 0x4b6   : > { %s1954_s16 = scalar_lea.vmem %s1953_s22, 4096  ;;  %p1955_p8 = scmp.lt.s32.totalorder %s2577_s17, %s1953_s22 }
 0x4b7   : > { %p1950_p5 = pnand %p1949_p13, %p2727_p1  ;;  %p1956_p11 = scmp.lt.s32.totalorder %s1954_s16, %s1948_s20 }
 0x4b9   : > { %p1951_p7 = pneg %p1950_p5  ;;  %p1957_p12 = por %p1956_p11, %p1955_p8 }
 0x4bb   : > { %p1958_p3 = pnand %p1957_p12, %p1951_p7 }
 0x4bd   : > { %1961 = shalt.err (!%p1958_p3)
}
 0x4be   : > { %s1962_s27 = scalar_lea.hbm %s2574_s28, 2048  ;;  %s1966_s25 = scalar_lea.hbm %s2696_s12, 4096 }
 0x4bf   : > { %p1963_p4 = scmp.ne.s32.totalorder %s2574_s28, %s1962_s27  ;;  %p1967_p9 = scmp.lt.u32.totalorder %s2574_s28, %s2696_s12 }
 0x4c0   : > { %p1968_p2 = scmp.lt.u32.totalorder %s1966_s25, %s1962_s27  ;;  %p1970_p13 = scmp.lt.u32.totalorder %s1962_s27, %s2574_s28 }
 0x4c1   : > { %p1964_p6 = pnand %p1963_p4, %p2727_p1 }
 0x4c2   : > { %p1969_p10 = por %p1968_p2, %p1967_p9 }
 0x4c3   : > { %p1965_p0 = pneg %p1964_p6 }
 0x4c4   : > { %p1971_p5 = por %p1970_p13, %p1969_p10 }
 0x4c6   : > { %p1972_p7 = pnand %p1971_p5, %p1965_p0 }
 0x4c8   : > { %1975 = shalt.err (!%p1972_p7)
}
 0x4c9   : > { %s2091_s20 = smov 128   ;;  %s2092_s16 = smov 8  }
 0x4ca   : > { %1745 = dma.vmem_to_hbm [thread:$0]  (%p2727_p1), %s2577_s17, 2048, %s2574_s28, %s2547_s1, %s2091_s20, %s2091_s20, %s2092_s16  }
 0x4cb   : > { %s1501_s24 = sshll.u32 %s2198_s0, 4  ;;  %s1269_s14 = sshll.u32 %s475_s2, 4  ;;  %s1270_s14 = int_to_ptr.vmem [resolvable:$true] %s1269_s14 }
 0x4cc   : > { %s2605_s27 = scalar_lea.hbm %s2697_s13, %s1501_s24  ;;  %s1215_s22 = scalar_lea.sflag [#allocation12], %s2284_s15 }
 0x4cd   : > { %s1976_s26 = scalar_lea.vmem %s1270_s14, 16  ;;  %s2093_s3 = smov [#allocation11]  }
 0x4ce   : > { %p1977_p8 = scmp.ne.s32.totalorder %s1270_s14, %s1976_s26  ;;  %s1980_s4 = sshll.u32 %s2093_s3, 4  ;;  %s1981_s4 = int_to_ptr.vmem [resolvable:$false] %s1980_s4 }
 0x4cf   : > { %s1982_s5 = scalar_lea.vmem %s1981_s4, 32  ;;  %p1983_p3 = scmp.lt.s32.totalorder %s1270_s14, %s1981_s4 }
 0x4d0   : > { %p1978_p11 = pnand %p1977_p8, %p2727_p1  ;;  %p1984_p4 = scmp.lt.s32.totalorder %s1982_s5, %s1976_s26 }
 0x4d2   : > { %p1979_p12 = pneg %p1978_p11  ;;  %p1985_p6 = por %p1984_p4, %p1983_p3 }
 0x4d4   : > { %p1986_p0 = pnand %p1985_p6, %p1979_p12 }
 0x4d6   : > { %1989 = shalt.err (!%p1986_p0)
}
 0x4d7   : > { %s1990_s1 = scalar_lea.hbm %s2605_s27, 16  ;;  %s1994_s3 = scalar_lea.hbm %s2697_s13, 32 }
 0x4d8   : > { %p1991_p9 = scmp.ne.s32.totalorder %s2605_s27, %s1990_s1  ;;  %p1995_p13 = scmp.lt.u32.totalorder %s2605_s27, %s2697_s13 }
 0x4d9   : > { %p1996_p5 = scmp.lt.u32.totalorder %s1994_s3, %s1990_s1  ;;  %p1998_p8 = scmp.lt.u32.totalorder %s1990_s1, %s2605_s27 }
 0x4da   : > { %p1992_p2 = pnand %p1991_p9, %p2727_p1 }
 0x4db   : > { %p1997_p7 = por %p1996_p5, %p1995_p13 }
 0x4dc   : > { %p1993_p10 = pneg %p1992_p2 }
 0x4dd   : > { %p1999_p11 = por %p1998_p8, %p1997_p7 }
 0x4df   : > { %p2000_p12 = pnand %p1999_p11, %p1993_p10 }
 0x4e1   : > { %2003 = shalt.err (!%p2000_p12)
}
 0x4e2   : > { %1746 = dma.vmem_to_hbm [thread:$0]  (%p2727_p1), %s1270_s14, 16, %s2605_s27, %s1215_s22   ;;  %v1492_v11 = vld [vmem:[%s2693_s9] ss:$0 sm:$0xff] }
 0x4e3   : > { %s2728_s20 = sshll.u32 %s2284_s15, 3  ;;  %s2729_s23 = sshll.u32 %s2198_s0, 7 }
 0x4e4   : > { %s455_s16 = scalar_lea.vmem [#allocation7], %s2728_s20  ;;  %s2638_s27 = scalar_lea.hbm %s2694_s10, %s2729_s23 }
 0x4e5   : > { %s1227_s24 = sshll.u32 %s455_s16, 4  ;;  %s1200_s14 = scalar_lea.sflag [#allocation6], %s2284_s15  ;;  %s2640_s24 = int_to_ptr.vmem [resolvable:$true] %s1227_s24 }
 0x4e6   : > { %s2004_s22 = scalar_lea.vmem %s2640_s24, 128  ;;  %s2094_s2 = smov [#allocation7]  }
 0x4e7   : > { %p2005_p3 = scmp.ne.s32.totalorder %s2640_s24, %s2004_s22  ;;  %s2008_s0 = sshll.u32 %s2094_s2, 4  ;;  %s2009_s0 = int_to_ptr.vmem [resolvable:$false] %s2008_s0 }
 0x4e8   : > { %s2010_s28 = scalar_lea.vmem %s2009_s0, 256  ;;  %p2011_p0 = scmp.lt.s32.totalorder %s2640_s24, %s2009_s0 }
 0x4e9   : > { %p2006_p4 = pnand %p2005_p3, %p2727_p1  ;;  %p2012_p9 = scmp.lt.s32.totalorder %s2010_s28, %s2004_s22 }
 0x4eb   : > { %p2007_p6 = pneg %p2006_p4  ;;  %p2013_p2 = por %p2012_p9, %p2011_p0 }
 0x4ed   : > { %p2014_p10 = pnand %p2013_p2, %p2007_p6 }
 0x539   : > { %v1080_v10 = vpop.f32.mrb[20].mxu0 }
 0x53a   : > { %v1081_v12 = vadd.f32 %v1080_v10, %v2535_v1  ;;  %v1678_v13 = vpop.f32.mrb[21].mxu0 }
 0x53b   : > { %v1083_v14 = vpop.f32.mrb[22].mxu0 }
 0x53c   : > { %v1093_v15 = vadd.f32 %v1492_v11, %v1081_v12  ;;  %v1679_v16 = vpop.f32.mrb[23].mxu0 }
 0x53e   : > { %1878 = vtanh.f32 %v1093_v15 }
 0x548   : > { %v1879_v17 = vpop.eup %1878 }
 0x549   : > { %1180 = vst [vmem:[%s455_s16] sm:$0xff] %v1879_v17 }
 0x54a   : > { %2017 = shalt.err (!%p2014_p10)
}
 0x54b   : > { %s2018_s15 = scalar_lea.hbm %s2638_s27, 128  ;;  %s2022_s4 = scalar_lea.hbm %s2694_s10, 256 }
 0x54c   : > { %p2019_p13 = scmp.ne.s32.totalorder %s2638_s27, %s2018_s15  ;;  %p2023_p8 = scmp.lt.u32.totalorder %s2638_s27, %s2694_s10 }
 0x54d   : > { %p2024_p11 = scmp.lt.u32.totalorder %s2022_s4, %s2018_s15  ;;  %p2026_p3 = scmp.lt.u32.totalorder %s2018_s15, %s2638_s27 }
 0x54e   : > { %p2020_p5 = pnand %p2019_p13, %p2727_p1 }
 0x54f   : > { %p2025_p12 = por %p2024_p11, %p2023_p8 }
 0x550   : > { %p2021_p7 = pneg %p2020_p5 }
 0x551   : > { %p2027_p4 = por %p2026_p3, %p2025_p12 }
 0x553   : > { %p2028_p6 = pnand %p2027_p4, %p2021_p7 }
 0x555   : > { %2031 = shalt.err (!%p2028_p6)
}
 0x556   : > { %1743 = dma.vmem_to_hbm [thread:$0]  (%p2727_p1), %s2640_s24, 128, %s2638_s27, %s1200_s14  }
 0x557 PF: > { %s1281_s20 = sand.u32 1, %s2068_s18   ;;  %p2730_p0 = scmp.ne.s32.totalorder %s2716_s30, 0 }
 0x558   : > { %p2731_p9 = scmp.ge.s32.totalorder %s2080_s21, 2  ;;  %s1282_s16 = scalar_lea.sflag [#allocation6], %s1281_s20 }
 0x55a   : > { %p1756_p2 = pnand %p2731_p9, %p2730_p0 }
 0x55c   : > { %2055 = dma.done.wait (!%p1756_p2), %s1282_s16, 128  }
 0x55d   : > { %2057 = vsyncadd (!%p1756_p2), %s1282_s16, 4294967168  ;;  %s2732_s23 = sadd.s32 4294967294, %s2080_s21  }
 0x55e   : > { %s1290_s25 = sand.u32 1, %s2732_s23  }
 0x55f   : > { %s1291_s1 = scalar_lea.sflag [#allocation9], %s1290_s25 }
 0x560   : > { %2059 = dma.done.wait (!%p1756_p2), %s1291_s1, 2176  }
 0x561   : > { %2061 = vsyncadd (!%p1756_p2), %s1291_s1, 4294965120  ;;  %s1309_s29 = scalar_lea.sflag [#allocation12], %s1281_s20 }
 0x562   : > { %2063 = dma.done.wait (!%p1756_p2), %s1309_s29, 16  }
 0x563   : > { %2065 = vsyncadd (!%p1756_p2), %s1309_s29, 4294967280  ;;  %s2733_s21 = sld [smem:[#allocation19_spill]]  ;;  %s2734_s24 = sld [smem:[#allocation18_spill]] }
 0x564   : > { %s2735_s20 = sld [smem:[#allocation20_spill]]  ;;  %s2736_s18 = smov %s2072_s19 }
 0x569   : > { %p37_p1 = scmp.ge.s32.totalorder %s2733_s21, 4   ;;  %s2737_s19 = smov %s2734_s24 }
 0x56b   :  { %39 = sbr.rel (!%p37_p1) target bundleno = 22 (0x16), region = 153 }
 0x572   :  { %1313 = vsyncpa [#allocation5], 1 }
 0x573   :  { %1315 = vsyncpa [#allocation5 + $0x1], 1 }
 0x574   :  { %1316 = vsyncpa [#allocation6], 1 }
 0x575   :  { %1318 = vsyncpa [#allocation6 + $0x1], 1 }
 0x576   :  { %1319 = vsyncpa [#allocation9], 1 }
 0x577   :  { %1321 = vsyncpa [#allocation9 + $0x1], 1 }
 0x578   :  { %1322 = vsyncpa [#allocation12], 1 }
 0x579   :  { %1324 = vsyncpa [#allocation12 + $0x1], 1 }

</bundles_post_ra>
